<compile_context>
chip_gen: v7x
topology: tpu7x:2x2x1
jax: 0.10.0
libtpu: 0.0.40
codegen_flags: <defaults>
</compile_context>

<pallas_src>
import jax
import jax.numpy as jnp
from jax.experimental import pallas as pl
from jax.experimental.pallas import tpu as pltpu


def nlinear_kernel(x_ref, m_ref, rs_ref, rp_ref, b_ref, o_ref):
    # x_ref : [Bt, S*C] f32   batch-row tile of the (free-reshaped) input
    # m_ref : [S*C, P*C] f32  block-diagonal weight  kron(W^T, I_C)
    # rs_ref: [C, S*C]  f32   lane-broadcast selector kron(1_{1xS}, I_C)
    # rp_ref: [C, P*C]  f32   lane-broadcast selector kron(1_{1xP}, I_C)
    # b_ref : [1, P*C]  f32   bias repeated per channel
    # o_ref : [Bt, P*C] f32
    x = x_ref[...]
    c = rs_ref.shape[0]
    last = x[:, x.shape[1] - c:]                      # [Bt, C] == x[:, S-1, :]
    # Broadcast seq_last across the S (resp. P) steps along lanes via tiny
    # selector matmuls (guaranteed lowering; MXU/XLU work is free filler under
    # an HBM-bound kernel).
    last_s = jnp.dot(last, rs_ref[...], preferred_element_type=jnp.float32)
    last_p = jnp.dot(last, rp_ref[...], preferred_element_type=jnp.float32)
    xc = x - last_s                                   # exact f32 centering
    y = jnp.dot(xc, m_ref[...], preferred_element_type=jnp.float32)
    o_ref[...] = (y + last_p + b_ref[...]).astype(o_ref.dtype)


def _round_up(v, m):
    return pl.cdiv(v, m) * m


def _choose_batch_tile(batch, lane_in, lane_out):
    """Batch-row tile (block sublane dim), grid size, and explicit VMEM limit."""
    try:
        phys = pltpu.get_tpu_info().vmem_capacity_bytes   # 128 MiB v5e/v6e, 64 MiB v7x
    except Exception:
        phys = 64 << 20                                   # assume the smallest (v7x)
    # Raise past the 16/32 MiB scoped defaults, stay clear of physical VMEM.
    vmem_limit = int(min(3 * phys // 4, 64 << 20))

    li = _round_up(lane_in, 128)                          # VMEM lane padding
    lo = _round_up(lane_out, 128)
    # Weight / selector / bias blocks, conservatively counted double-buffered.
    fixed = 2 * 4 * (li * lo + 8 * li + 16 * lo)
    per_row = 2 * 4 * (li + lo)                           # double-buffered in + out row
    budget = vmem_limit - (8 << 20)                       # Mosaic-internal headroom
    max_rows = max(8, (budget - fixed) // per_row)

    if batch <= max_rows:
        bt, n_tiles = batch, 1
        if batch >= 16:                                   # cheap 2-way split so both
            bt = _round_up(pl.cdiv(batch, 2), 8)          # v7x TensorCores get a tile
            n_tiles = pl.cdiv(batch, bt)
    else:
        bt = max(8, (max_rows // 8) * 8)
        n_tiles = pl.cdiv(batch, bt)
        if n_tiles > 1 and n_tiles % 2:                   # prefer even steps for v7x's 2 TCs
            bt2 = _round_up(pl.cdiv(batch, n_tiles + 1), 8)
            if bt2 >= 8:
                bt, n_tiles = bt2, pl.cdiv(batch, bt2)
    return bt, n_tiles, vmem_limit


def nlinear_forward(x, weight, bias):
    """NLinear forward (individual=False). x: [B,S,C], weight: [P,S], bias: [P] -> [B,P,C]."""
    B, S, C = x.shape
    P = weight.shape[0]
    lane_in, lane_out = S * C, P * C
    f32 = jnp.float32

    # Free reshape (merges contiguous trailing dims) -- no HBM relayout pass.
    x2 = x.reshape(B, lane_in)

    eye_c = jnp.eye(C, dtype=f32)
    w_kron = jnp.kron(weight.astype(f32).T, eye_c)            # [S*C, P*C]
    sel_s = jnp.kron(jnp.ones((1, S), f32), eye_c)            # [C, S*C]
    sel_p = jnp.kron(jnp.ones((1, P), f32), eye_c)            # [C, P*C]
    bias_t = jnp.repeat(bias.astype(f32), C).reshape(1, lane_out)

    bt, n_tiles, vmem_limit = _choose_batch_tile(B, lane_in, lane_out)

    out2 = pl.pallas_call(
        nlinear_kernel,
        out_shape=jax.ShapeDtypeStruct((B, lane_out), x.dtype),
        grid_spec=pltpu.PrefetchScalarGridSpec(
            num_scalar_prefetch=0,
            grid=(n_tiles,),
            in_specs=[
                pl.BlockSpec((bt, lane_in), lambda b: (b, 0)),
                pl.BlockSpec((lane_in, lane_out), lambda b: (0, 0)),
                pl.BlockSpec((C, lane_in), lambda b: (0, 0)),
                pl.BlockSpec((C, lane_out), lambda b: (0, 0)),
                pl.BlockSpec((1, lane_out), lambda b: (0, 0)),
            ],
            out_specs=pl.BlockSpec((bt, lane_out), lambda b: (b, 0)),
        ),
        compiler_params=pltpu.CompilerParams(
            dimension_semantics=("parallel",),
            vmem_limit_bytes=vmem_limit,
        ),
    )(x2, w_kron, sel_s, sel_p, bias_t)

    # Free reshape back to [B, P, C]; no tail slice needed (Pallas masks the
    # out-of-bounds rows of a ragged last batch tile).
    return out2.reshape(B, P, C)


def nlinear_reference(x, weight, bias):
    seq_last = x[:, -1:, :]
    xc = x - seq_last
    y = jnp.einsum("ps,bsc->bpc", weight, xc,
                   precision=jax.lax.Precision.HIGHEST)
    return y + bias[None, :, None] + seq_last


if __name__ == "__main__":
    # Small config consistent with the module: seq_len=8, pred_len=4, enc_in=4
    B, seq_len, pred_len, channels = 2, 8, 4, 4

    key = jax.random.PRNGKey(0)
    kx, kw, kb = jax.random.split(key, 3)

    x = jax.random.normal(kx, (B, seq_len, channels), dtype=jnp.float32)

    # Deterministic nn.Linear-style init: U(-1/sqrt(in), 1/sqrt(in))
    bound = 1.0 / (seq_len ** 0.5)
    weight = jax.random.uniform(kw, (pred_len, seq_len), jnp.float32,
                                minval=-bound, maxval=bound)
    bias = jax.random.uniform(kb, (pred_len,), jnp.float32,
                              minval=-bound, maxval=bound)

    out = jax.block_until_ready(nlinear_forward(x, weight, bias))
    ref = nlinear_reference(x, weight, bias)

    assert out.shape == (B, pred_len, channels)
    # All-f32 path (no bf16 casts): tight tolerance vs the f32 reference.
    err = jnp.max(jnp.abs(out - ref))
    assert jnp.allclose(out, ref, atol=1e-4, rtol=1e-4), f"max abs err {err}"

    print("KERNEL_OK")
</pallas_src>

<mosaic_0001>
module attributes {stable_mosaic.version = 11 : i64} {
  func.func @nlinear_kernel(%arg0: i32, %arg1: memref<2x32xf32, #tpu.memory_space<vmem>>, %arg2: memref<32x16xf32, #tpu.memory_space<vmem>>, %arg3: memref<4x32xf32, #tpu.memory_space<vmem>>, %arg4: memref<4x16xf32, #tpu.memory_space<vmem>>, %arg5: memref<1x16xf32, #tpu.memory_space<vmem>>, %arg6: memref<2x16xf32, #tpu.memory_space<vmem>>) attributes {dimension_semantics = [#tpu.dimension_semantics<parallel>], iteration_bounds = array<i64: 1>, scalar_prefetch = 0 : i64, scratch_operands = 0 : i64, tpu.core_type = #tpu.core_type<tc>, window_params = [{transform_indices = @transform_0, window_bounds = array<i64: 2, 32>}, {pipeline_mode = #tpu.pipeline_mode<synchronous>, transform_indices = @transform_1, window_bounds = array<i64: 32, 16>}, {pipeline_mode = #tpu.pipeline_mode<synchronous>, transform_indices = @transform_2, window_bounds = array<i64: 4, 32>}, {pipeline_mode = #tpu.pipeline_mode<synchronous>, transform_indices = @transform_3, window_bounds = array<i64: 4, 16>}, {pipeline_mode = #tpu.pipeline_mode<synchronous>, transform_indices = @transform_4, window_bounds = array<i64: 1, 16>}, {transform_indices = @transform_5, window_bounds = array<i64: 2, 16>}]} {
    %c0 = arith.constant 0 : index
    %c0_0 = arith.constant 0 : index
    %0 = vector.load %arg1[%c0, %c0_0] : memref<2x32xf32, #tpu.memory_space<vmem>>, vector<2x32xf32>
    %1 = vector.extract_strided_slice %0 {offsets = [0, 28], sizes = [2, 4], strides = [1, 1]} : vector<2x32xf32> to vector<2x4xf32>
    %c0_1 = arith.constant 0 : index
    %c0_2 = arith.constant 0 : index
    %2 = vector.load %arg3[%c0_1, %c0_2] : memref<4x32xf32, #tpu.memory_space<vmem>>, vector<4x32xf32>
    %cst = arith.constant dense<0.000000e+00> : vector<2x32xf32>
    %3 = tpu.matmul %1, %2, %cst {dimension_numbers = #tpu.dot_dimension_numbers<[1], [0], [0], [1], [0, 0, 1, 1], [], []>} : vector<2x4xf32>, vector<4x32xf32>, vector<2x32xf32> -> vector<2x32xf32>
    %c0_3 = arith.constant 0 : index
    %c0_4 = arith.constant 0 : index
    %4 = vector.load %arg4[%c0_3, %c0_4] : memref<4x16xf32, #tpu.memory_space<vmem>>, vector<4x16xf32>
    %cst_5 = arith.constant dense<0.000000e+00> : vector<2x16xf32>
    %5 = tpu.matmul %1, %4, %cst_5 {dimension_numbers = #tpu.dot_dimension_numbers<[1], [0], [0], [1], [0, 0, 1, 1], [], []>} : vector<2x4xf32>, vector<4x16xf32>, vector<2x16xf32> -> vector<2x16xf32>
    %6 = arith.subf %0, %3 : vector<2x32xf32>
    %c0_6 = arith.constant 0 : index
    %c0_7 = arith.constant 0 : index
    %7 = vector.load %arg2[%c0_6, %c0_7] : memref<32x16xf32, #tpu.memory_space<vmem>>, vector<32x16xf32>
    %cst_8 = arith.constant dense<0.000000e+00> : vector<2x16xf32>
    %8 = tpu.matmul %6, %7, %cst_8 {dimension_numbers = #tpu.dot_dimension_numbers<[1], [0], [0], [1], [0, 0, 1, 1], [], []>} : vector<2x32xf32>, vector<32x16xf32>, vector<2x16xf32> -> vector<2x16xf32>
    %9 = arith.addf %8, %5 : vector<2x16xf32>
    %c0_9 = arith.constant 0 : index
    %c0_10 = arith.constant 0 : index
    %10 = vector.load %arg5[%c0_9, %c0_10] : memref<1x16xf32, #tpu.memory_space<vmem>>, vector<1x16xf32>
    %11 = vector.broadcast %10 : vector<1x16xf32> to vector<2x16xf32>
    %12 = arith.addf %9, %11 : vector<2x16xf32>
    %c0_11 = arith.constant 0 : index
    %c0_12 = arith.constant 0 : index
    %13 = vector.load %arg6[%c0_11, %c0_12] : memref<2x16xf32, #tpu.memory_space<vmem>>, vector<2x16xf32>
    tpu.vector_store %arg6[%c0_11, %c0_12], %12 {strides = array<i32>} : memref<2x16xf32, #tpu.memory_space<vmem>>, vector<2x16xf32>,
    return
  }
  func.func @transform_0(%arg0: i32) -> (i32, i32) {
    %c0_i32 = arith.constant 0 : i32
    %c0_i32_0 = arith.constant 0 : i32
    return %arg0, %c0_i32 : i32, i32
  }
  func.func @transform_1(%arg0: i32) -> (i32, i32) {
    %c0_i32 = arith.constant 0 : i32
    %c0_i32_0 = arith.constant 0 : i32
    %c0_i32_1 = arith.constant 0 : i32
    return %c0_i32, %c0_i32_0 : i32, i32
  }
  func.func @transform_2(%arg0: i32) -> (i32, i32) {
    %c0_i32 = arith.constant 0 : i32
    %c0_i32_0 = arith.constant 0 : i32
    %c0_i32_1 = arith.constant 0 : i32
    return %c0_i32, %c0_i32_0 : i32, i32
  }
  func.func @transform_3(%arg0: i32) -> (i32, i32) {
    %c0_i32 = arith.constant 0 : i32
    %c0_i32_0 = arith.constant 0 : i32
    %c0_i32_1 = arith.constant 0 : i32
    return %c0_i32, %c0_i32_0 : i32, i32
  }
  func.func @transform_4(%arg0: i32) -> (i32, i32) {
    %c0_i32 = arith.constant 0 : i32
    %c0_i32_0 = arith.constant 0 : i32
    %c0_i32_1 = arith.constant 0 : i32
    return %c0_i32, %c0_i32_0 : i32, i32
  }
  func.func @transform_5(%arg0: i32) -> (i32, i32) {
    %c0_i32 = arith.constant 0 : i32
    %c0_i32_0 = arith.constant 0 : i32
    return %arg0, %c0_i32 : i32, i32
  }
}

</mosaic_0001>

<bundles_post_ra>
// kernel: tpu_custom_call.1
= control target key start
LH: loop header
LB: loop body
LE: loop exit
PB: predicated region body
PF: predicated region fallthrough
CT: control target
= control target key end

     0   :  { %s351_s22 = smov 100   ;;  %v352_v2 = vmov 0.0   ;;  %vm29_vm0 = vcmask 1043456   ;;  %vm353_vm1 = vmmov 0   ;;  %s427_s0 = inlined_call_operand.vmem [shape: f32[2,32], index: 0, kind: input, shape index: {}]   ;;  %s428_s1 = inlined_call_operand.vmem [shape: f32[32,16], index: 1, kind: input, shape index: {}]   ;;  %s429_s2 = inlined_call_operand.vmem [shape: f32[4,32], index: 2, kind: input, shape index: {}]   ;;  %s430_s3 = inlined_call_operand.vmem [shape: f32[4,16], index: 3, kind: input, shape index: {}]   ;;  %s431_s4 = inlined_call_operand.vmem [shape: f32[1,16], index: 4, kind: input, shape index: {}]   ;;  %s432_s5 = inlined_call_operand.hbm [shape: f32[2,16], index: 5, kind: output, shape index: {}]  }
   0x1   :  { %v21_v0 = vld [vmem:[%s427_s0] sm:$0x3]  ;;  %295 = vmatprep.subr.mxu1 %v352_v2  ;;  %297 = vmatprep.mubr.msk.f32.mxu1 %vm353_vm1, %v352_v2  ;;  %v179_v4 = vld [vmem:[%s428_s1 + $0x8] sm:$0xff] }
   0x2   :  { %v22_v1 = vld [vmem:[%s429_s2] sm:$0xf]  ;;  %24 = vrot.lane.b32.xlu0 %v21_v0, %s351_s22 }
   0x3   :  { %296 = vmatpush3.msk.msra.mxu1 %vm29_vm0, %v22_v1  ;;  %v178_v3 = vld [vmem:[%s428_s1] sm:$0xff] }
   0x4   :  { %10 = vsyncpa [#allocation3], 0  ;;  %300 = vmatprep.subr.mxu1 %v352_v2  ;;  %v354_v5 = vmov 0.0|0.0   ;;  %v317_v6 = vpack.c.bf16 %v179_v4, %v178_v3  ;;  %313 = vmatprep.mubr.msk.f32.mxu0 %vm353_vm1, %v352_v2  ;;  %vm26_vm2 = vcmask 31744   ;;  %v103_v7 = vld [vmem:[%s430_s3] sm:$0xf] }
   0x5   :  { %316 = vmatprep.subr.bf16.mxu0 %v354_v5  ;;  %v180_v9 = vld [vmem:[%s428_s1 + $0x10] sm:$0xff]  ;;  %v181_v10 = vld [vmem:[%s428_s1 + $0x18] sm:$0xff]  ;;  %vm182_vm3 = vcmask 261120   ;;  %v285_v18 = vld [vmem:[%s431_s4] ss:$0 sm:$0xff]  ;;  %s355_s7 = smov [#allocation2]  }
   0x6   :  { %318 = vmatpush3.bf16.msra.mxu0 %v317_v6  ;;  %v320_v11 = vpack.c.bf16 %v181_v10, %v180_v9  ;;  %s272_s8 = sshll.u32 %s355_s7, 4  ;;  %vm264_vm4 = vcmask 123904   ;;  %s273_s8 = int_to_ptr.vmem [resolvable:$true] %s272_s8 }
   0x7   :  { %319 = vmatprep.subr.bf16.mxu0 %v354_v5  ;;  %s327_s1 = scalar_lea.vmem %s273_s8, 32  ;;  %p332_p1 = scmp.lt.s32.totalorder %s273_s8, %s273_s8 }
   0x8   :  { %p328_p0 = scmp.ne.s32.totalorder %s273_s8, %s327_s1  ;;  %p333_p2 = scmp.lt.s32.totalorder %s327_s1, %s327_s1 }
   0xa   :  { %321 = vmatpush3.bf16.msra.mxu0 %v320_v11  ;;  %p334_p3 = por %p333_p2, %p332_p1 }
   0xc   :  { %p335_p4 = pnand %p334_p3, %p328_p0 }
  0x74   :  { %v25_v8 = vpop.permute.xlu0 %24 }
  0x75   :  { %298 = vmatmul.mubr.msk.f32.vlgmr.msra.gmra.mrb[0].mxu1 %vm26_vm2, %v25_v8 }
  0x76   :  { %301 = vmatpush3.msk.msra.mxu1 %vm29_vm0, %v103_v7  ;;  %302 = vmatprep.mubr.msk.f32.mxu1 %vm353_vm1, %v352_v2 }
  0x79   :  { %303 = vmatmul.mubr.msk.f32.vlgmr.msra.gmra.mrb[2].mxu1 %vm26_vm2, %v25_v8 }
 0x148   :  { %v99_v12 = vpop.f32.mrb[0].mxu1 }
 0x149   :  { %v177_v13 = vsub.f32 %v21_v0, %v99_v12  ;;  %v299_v14 = vpop.f32.mrb[1].mxu1 }
 0x14b   :  { %314 = vmatmul.mubr.msk.f32.vlgmr.msra.gmra.mrb[0].mxu0 %vm182_vm3, %v177_v13 }
 0x14c   :  { %v173_v15 = vpop.f32.mrb[2].mxu1 }
 0x14d   :  { %v304_v16 = vpop.f32.mrb[3].mxu1 }
 0x21e   :  { %v252_v17 = vpop.f32.mrb[0].mxu0 }
 0x21f   :  { %v253_v19 = vadd.f32 %v252_v17, %v173_v15  ;;  %v315_v20 = vpop.f32.mrb[1].mxu0 }
 0x221   :  { %v263_v21 = vadd.f32 %v285_v18, %v253_v19 }
 0x223   :  { %265 = vst.msk [vmem:[#allocation2] sm:$0x3] %vm264_vm4, %v263_v21 }
 0x224   :  { %338 = shalt.err (!%p335_p4)
}
 0x225   :  { %s339_s11 = scalar_lea.hbm %s432_s5, 32 }
 0x226   :  { %p340_p5 = scmp.ne.s32.totalorder %s432_s5, %s339_s11  ;;  %p343_p6 = scmp.lt.u32.totalorder %s339_s11, %s432_s5 }
 0x228   :  { %p345_p7 = pnand %p343_p6, %p340_p5 }
 0x22a   :  { %348 = shalt.err (!%p345_p7)
}
 0x22b   :  { %275 = dma.vmem_to_hbm [thread:$0]  %s273_s8, 32, %s432_s5, [#allocation3]  }
 0x22c   :  { %349 = dma.done.wait [#allocation3], 32  }
 0x22d   :  { %350 = vsyncadd [#allocation3], 4294967264 }
 0x22e   :  { %279 = vsyncpa [#allocation3], 1 }

</bundles_post_ra>
